<compile_context>
chip_gen: v6e
topology: v6e:2x2x1
jax: 0.10.0
libtpu: 0.0.40
codegen_flags: <defaults>
</compile_context>

<pallas_src>
import jax
import jax.numpy as jnp
from jax import lax
from jax.experimental import pallas as pl
from jax.experimental.pallas import tpu as pltpu

EPS = 1e-6


def _softplus(x):
    # matches torch.nn.functional.softplus(beta=1, threshold=20)
    return jnp.where(x > 20.0, x, jnp.log1p(jnp.exp(jnp.minimum(x, 20.0))))


def _make_kernels(C, Cqp):
    bf16 = jnp.bfloat16
    f32 = jnp.float32

    def _dot_nt(a, b):  # contract the last (N) axis of both operands
        return lax.dot_general(a, b, (((1,), (1,)), ((), ())),
                               preferred_element_type=f32)

    # ---------------- phase 1: reduction over N tiles ----------------
    # Per batch, accumulate in f32 VMEM scratch:
    #   en_acc (C, C)   = x @ x^T          (CAM energy, split-f32 for accuracy)
    #   kv_acc (C, Cqp) = v @ k^T          (PAM KV, stored transposed)
    # and in the f32 output block:
    #   ksum   (Cqp, 1) = sum_n k
    # On the last tile the stable CAM softmax is finalized and the fused bf16
    # [attn | KV^T] block is written once.
    def reduce_kernel(x_ref, wkv_ref, bkv_ref, fused_ref, ksum_ref,
                      en_acc, kv_acc):
        nt = pl.program_id(1)
        x = x_ref[...]                                    # (C, TN) f32
        xb = x.astype(bf16)                               # hi part (exact bf16)
        xl = (x - xb.astype(f32)).astype(bf16)            # lo part

        # fused [wk_pad ; wv] projection: one bf16 MXU pass for K and V
        pre = jnp.dot(wkv_ref[...], xb,
                      preferred_element_type=f32) + bkv_ref[...]   # (Cqp+C, TN) f32
        k = _softplus(pre[:Cqp])                          # (Cqp, TN); pad rows == 0
        v = pre[Cqp:]                                     # (C, TN)

        kv_upd = _dot_nt(v.astype(bf16), k.astype(bf16))  # (C, Cqp) = v @ k^T
        ks_upd = jnp.sum(k, axis=-1, keepdims=True)       # (Cqp, 1) f32
        # split-f32 energy (3 bf16 passes, f32 accumulation): faithful enough for
        # the exponentiating softmax, ~2x cheaper than a full-f32 MXU matmul.
        en_upd = _dot_nt(xb, xb) + _dot_nt(xb, xl) + _dot_nt(xl, xb)   # (C, C)

        @pl.when(nt == 0)
        def _():
            kv_acc[...] = kv_upd
            en_acc[...] = en_upd
            ksum_ref[...] = ks_upd

        @pl.when(nt > 0)
        def _():
            kv_acc[...] += kv_upd
            en_acc[...] += en_upd
            ksum_ref[...] += ks_upd

        @pl.when(nt == pl.num_programs(1) - 1)
        def _():
            en = en_acc[...]
            # softmax(rowmax(en) - en) == exp(rowmin(en) - en) / rowsum(...)
            # (exponents <= 0  =>  no overflow; fixes the previous inf/nan bug)
            p = jnp.exp(jnp.min(en, axis=-1, keepdims=True) - en)
            inv = pl.reciprocal(jnp.sum(p, axis=-1, keepdims=True), approx=False)
            fused_ref[:, :C] = (p * inv).astype(bf16)     # attn     (C, C)
            fused_ref[:, C:] = kv_acc[...].astype(bf16)   # KV^T     (C, Cqp)

    # ---------------- phase 2: fully parallel output tiles ----------------
    def apply_kernel(gammas_ref, x_ref, wq_ref, bq_ref, fused_ref, ksum_ref,
                     o_ref):
        x = x_ref[...]                                    # (C, TN) f32
        xb = x.astype(bf16)
        gamma_p = gammas_ref[0]
        gamma_c = gammas_ref[1]

        q = _softplus(jnp.dot(wq_ref[...], xb,
                              preferred_element_type=f32) + bq_ref[...])  # (Cqp, TN)

        ksum = ksum_ref[...] + EPS                        # (Cqp, 1); pad rows -> EPS
        denom = jnp.sum(q * ksum, axis=0, keepdims=True)  # (1, TN); pad q rows are 0
        norm = pl.reciprocal(denom, approx=True)          # (1, TN)

        # single fused GEMM:
        #   [attn | KV^T] @ [gamma_c*x ; (gamma_p*norm)*q]
        #     = gamma_c*(attn @ x) + gamma_p*((KV^T @ q) * norm)
        rhs = jnp.concatenate(
            [(gamma_c * x).astype(bf16), (q * (gamma_p * norm)).astype(bf16)],
            axis=0)                                       # (C+Cqp, TN) bf16
        fused_out = jnp.dot(fused_ref[...], rhs,
                            preferred_element_type=f32)   # (C, TN) f32

        # pam + cam = 2*x + gamma_p*(KV^T q * norm) + gamma_c*(attn @ x)
        o_ref[...] = 2.0 * x + fused_out

    return reduce_kernel, apply_kernel


def _pick_tile_n(N, C):
    # Largest lane-dense tile whose f32 working set (double-buffered x + projection
    # temps ~ 12*C*TN bytes) stays comfortably inside VMEM; the 1024 cap keeps the
    # same choice safe on v7x (64 MiB physical).
    budget = 16 * 1024 * 1024
    for cand in (1024, 512, 256, 128):
        if N % cand == 0 and 12 * C * cand <= budget:
            return cand
    return N  # non-multiple-of-128 spatial sizes: single full-width tile


def pam_cam_layer(x_nchw, params, tile_n=None):
    B, C, H, W = x_nchw.shape
    N = H * W
    Cq = params["wq"].shape[0]
    Cqp = ((Cq + 15) // 16) * 16          # bf16-sublane-packing-friendly row count
    Cf = C + Cqp                          # fused [attn | KV^T] width
    CK = Cqp + C                          # fused [wk_pad ; wv] rows
    TN = _pick_tile_n(N, C) if tile_n is None else tile_n
    assert N % TN == 0
    NT = N // TN

    f32, bf16 = jnp.float32, jnp.bfloat16
    x_flat = x_nchw.reshape(B, C, N).astype(f32)
    gammas = jnp.stack([params["gamma_pam"], params["gamma_cam"]]).astype(f32)

    pad = Cqp - Cq
    NEG = jnp.float32(-1e4)               # softplus(-1e4) == 0 exactly in f32

    def pad_rows(w, b):
        wp = jnp.concatenate([w.astype(f32), jnp.zeros((pad, C), f32)], axis=0)
        bp = jnp.concatenate([b.astype(f32), jnp.full((pad, 1), NEG, f32)], axis=0)
        return wp.astype(bf16), bp        # weights pre-cast to bf16, bias stays f32

    wq_p, bq_p = pad_rows(params["wq"], params["bq"])
    wk_p, bk_p = pad_rows(params["wk"], params["bk"])
    wkv = jnp.concatenate([wk_p, params["wv"].astype(bf16)], axis=0)   # (CK, C) bf16
    bkv = jnp.concatenate([bk_p, params["bv"].astype(f32)], axis=0)    # (CK, 1) f32

    reduce_kernel, apply_kernel = _make_kernels(C, Cqp)
    vmem_limit = 64 * 1024 * 1024

    # ---- phase 1: per-batch [attn | KV^T] and Ksum (reduction over N tiles)
    fused, ksum = pl.pallas_call(
        reduce_kernel,
        out_shape=(jax.ShapeDtypeStruct((B, C, Cf), bf16),
                   jax.ShapeDtypeStruct((B, Cqp, 1), f32)),
        grid=(B, NT),
        in_specs=[
            pl.BlockSpec((pl.Squeezed(), C, TN), lambda b, nt: (b, 0, nt)),  # x
            pl.BlockSpec((CK, C), lambda b, nt: (0, 0)),                     # wkv (bf16)
            pl.BlockSpec((CK, 1), lambda b, nt: (0, 0)),                     # bkv (f32)
        ],
        out_specs=(
            pl.BlockSpec((pl.Squeezed(), C, Cf), lambda b, nt: (b, 0, 0)),   # [attn|KV^T]
            pl.BlockSpec((pl.Squeezed(), Cqp, 1), lambda b, nt: (b, 0, 0)),  # ksum
        ),
        scratch_shapes=[pltpu.VMEM((C, C), f32),       # energy accumulator
                        pltpu.VMEM((C, Cqp), f32)],    # KV^T accumulator
        compiler_params=pltpu.CompilerParams(
            dimension_semantics=("parallel", "arbitrary"),
            vmem_limit_bytes=vmem_limit),
    )(x_flat, wkv, bkv)

    # ---- phase 2: fully parallel output tiles
    out_flat = pl.pallas_call(
        apply_kernel,
        out_shape=jax.ShapeDtypeStruct((B, C, N), f32),
        grid=(B, NT),
        in_specs=[
            pl.BlockSpec(memory_space=pltpu.MemorySpace.SMEM),               # gammas
            pl.BlockSpec((pl.Squeezed(), C, TN), lambda b, nt: (b, 0, nt)),  # x
            pl.BlockSpec((Cqp, C), lambda b, nt: (0, 0)),                    # wq (bf16)
            pl.BlockSpec((Cqp, 1), lambda b, nt: (0, 0)),                    # bq (f32)
            pl.BlockSpec((pl.Squeezed(), C, Cf), lambda b, nt: (b, 0, 0)),   # [attn|KV^T]
            pl.BlockSpec((pl.Squeezed(), Cqp, 1), lambda b, nt: (b, 0, 0)),  # ksum
        ],
        out_specs=pl.BlockSpec((pl.Squeezed(), C, TN), lambda b, nt: (b, 0, nt)),
        compiler_params=pltpu.CompilerParams(
            dimension_semantics=("parallel", "parallel"),
            vmem_limit_bytes=vmem_limit),
    )(gammas, x_flat, wq_p, bq_p, fused, ksum)

    return out_flat.reshape(B, C, H, W)


def reference(x, params):
    """Pure-JAX f32 (HIGHEST-precision) transcription of the PyTorch forward pass."""
    B, C, H, W = x.shape
    N = H * W
    hp = jax.lax.Precision.HIGHEST
    xf = x.reshape(B, C, N).astype(jnp.float32)
    sp = _softplus
    q = sp(jnp.einsum('qc,bcn->bqn', params['wq'], xf, precision=hp) + params['bq'][None])
    k = sp(jnp.einsum('qc,bcn->bqn', params['wk'], xf, precision=hp) + params['bk'][None])
    v = jnp.einsum('dc,bcn->bdn', params['wv'], xf, precision=hp) + params['bv'][None]
    qT = jnp.transpose(q, (0, 2, 1))                               # (B, N, Cq)
    kv = jnp.einsum('bmn,bcn->bmc', k, v, precision=hp)
    norm = 1.0 / jnp.einsum('bnm,bm->bn', qT, jnp.sum(k, -1) + EPS, precision=hp)
    wv_ = jnp.einsum('bnm,bmc,bn->bcn', qT, kv, norm, precision=hp)
    pam = xf + params['gamma_pam'] * wv_
    energy = jnp.einsum('bcn,bdn->bcd', xf, xf, precision=hp)
    en = jnp.max(energy, -1, keepdims=True) - energy
    attn = jax.nn.softmax(en, axis=-1)
    cam = params['gamma_cam'] * jnp.einsum('bcd,bdn->bcn', attn, xf, precision=hp) + xf
    return (pam + cam).reshape(B, C, H, W)


if __name__ == "__main__":
    B, C, H, W = 2, 32, 16, 16
    scale = 8
    Cq = C // scale

    key = jax.random.PRNGKey(0)
    kx, kq, kk, kvk, kbq, kbk, kbv = jax.random.split(key, 7)

    x = jax.random.normal(kx, (B, C, H, W), dtype=jnp.float32)

    # Module __init__ sets gamma=0 (both branches pass-through); use nonzero
    # gammas so the attention paths are actually exercised.
    params = {
        "wq": 0.1 * jax.random.normal(kq, (Cq, C), dtype=jnp.float32),
        "bq": 0.1 * jax.random.normal(kbq, (Cq, 1), dtype=jnp.float32),
        "wk": 0.1 * jax.random.normal(kk, (Cq, C), dtype=jnp.float32),
        "bk": 0.1 * jax.random.normal(kbk, (Cq, 1), dtype=jnp.float32),
        "wv": 0.1 * jax.random.normal(kvk, (C, C), dtype=jnp.float32),
        "bv": 0.1 * jax.random.normal(kbv, (C, 1), dtype=jnp.float32),
        "gamma_pam": jnp.float32(0.5),
        "gamma_cam": jnp.float32(0.3),
    }

    # tile_n=128 -> 2 N-tiles per batch: exercises the phase-1 reduction path.
    out = jax.block_until_ready(pam_cam_layer(x, params, tile_n=128))
    ref = jax.block_until_ready(reference(x, params))

    assert out.shape == (B, C, H, W)
    # bf16 MXU operands (f32 accumulation), bf16 inter-phase storage and the approx
    # reciprocal give small drift vs the pure-f32 reference.
    assert jnp.allclose(out, ref, rtol=3e-2, atol=3e-2), "mismatch vs pure-JAX reference"

    print("KERNEL_OK")
</pallas_src>

<mosaic_0001>
module attributes {stable_mosaic.version = 11 : i64} {
  func.func @reduce_kernel(%arg0: i32, %arg1: i32, %arg2: memref<1x32x128xf32, #tpu.memory_space<vmem>>, %arg3: memref<48x32xbf16, #tpu.memory_space<vmem>>, %arg4: memref<48x1xf32, #tpu.memory_space<vmem>>, %arg5: memref<1x32x48xbf16, #tpu.memory_space<vmem>>, %arg6: memref<1x16x1xf32, #tpu.memory_space<vmem>>, %arg7: memref<32x32xf32, #tpu.memory_space<vmem>>, %arg8: memref<32x16xf32, #tpu.memory_space<vmem>>) attributes {dimension_semantics = [#tpu.dimension_semantics<parallel>, #tpu.dimension_semantics<arbitrary>], iteration_bounds = array<i64: 2, 2>, scalar_prefetch = 0 : i64, scratch_operands = 2 : i64, tpu.core_type = #tpu.core_type<tc>, window_params = [{transform_indices = @transform_0, window_bounds = array<i64: 1, 32, 128>}, {pipeline_mode = #tpu.pipeline_mode<synchronous>, transform_indices = @transform_1, window_bounds = array<i64: 48, 32>}, {pipeline_mode = #tpu.pipeline_mode<synchronous>, transform_indices = @transform_2, window_bounds = array<i64: 48, 1>}, {transform_indices = @transform_3, window_bounds = array<i64: 1, 32, 48>}, {transform_indices = @transform_4, window_bounds = array<i64: 1, 16, 1>}]} {
    %c0 = arith.constant 0 : index
    %c0_0 = arith.constant 0 : index
    %c0_1 = arith.constant 0 : index
    %0 = vector.load %arg2[%c0, %c0_0, %c0_1] : memref<1x32x128xf32, #tpu.memory_space<vmem>>, vector<1x32x128xf32>
    %1 = vector.shape_cast %0 : vector<1x32x128xf32> to vector<32x128xf32>
    %2 = arith.truncf %1 : vector<32x128xf32> to vector<32x128xbf16>
    %3 = arith.extf %2 : vector<32x128xbf16> to vector<32x128xf32>
    %4 = arith.subf %1, %3 : vector<32x128xf32>
    %5 = arith.truncf %4 : vector<32x128xf32> to vector<32x128xbf16>
    %c0_2 = arith.constant 0 : index
    %c0_3 = arith.constant 0 : index
    %6 = vector.load %arg3[%c0_2, %c0_3] : memref<48x32xbf16, #tpu.memory_space<vmem>>, vector<48x32xbf16>
    %cst = arith.constant dense<0.000000e+00> : vector<48x128xf32>
    %7 = tpu.matmul %6, %2, %cst {dimension_numbers = #tpu.dot_dimension_numbers<[1], [0], [0], [1], [0, 0, 1, 1], [], []>} : vector<48x32xbf16>, vector<32x128xbf16>, vector<48x128xf32> -> vector<48x128xf32>
    %c0_4 = arith.constant 0 : index
    %c0_5 = arith.constant 0 : index
    %8 = vector.load %arg4[%c0_4, %c0_5] : memref<48x1xf32, #tpu.memory_space<vmem>>, vector<48x1xf32>
    %9 = vector.broadcast %8 : vector<48x1xf32> to vector<48x128xf32>
    %10 = arith.addf %7, %9 : vector<48x128xf32>
    %11 = vector.extract_strided_slice %10 {offsets = [0, 0], sizes = [16, 128], strides = [1, 1]} : vector<48x128xf32> to vector<16x128xf32>
    %cst_6 = arith.constant 2.000000e+01 : f32
    %12 = vector.broadcast %cst_6 : f32 to vector<16x128xf32>
    %13 = arith.cmpf ogt, %11, %12 : vector<16x128xf32>
    %cst_7 = arith.constant 2.000000e+01 : f32
    %14 = vector.broadcast %cst_7 : f32 to vector<16x128xf32>
    %15 = arith.minimumf %11, %14 : vector<16x128xf32>
    %16 = math.exp %15 : vector<16x128xf32>
    %17 = math.log1p %16 : vector<16x128xf32>
    %18 = arith.select %13, %11, %17 : vector<16x128xi1>, vector<16x128xf32>
    %19 = vector.extract_strided_slice %10 {offsets = [16, 0], sizes = [32, 128], strides = [1, 1]} : vector<48x128xf32> to vector<32x128xf32>
    %20 = arith.truncf %19 : vector<32x128xf32> to vector<32x128xbf16>
    %21 = arith.truncf %18 : vector<16x128xf32> to vector<16x128xbf16>
    %cst_8 = arith.constant dense<0.000000e+00> : vector<32x16xf32>
    %22 = tpu.matmul %20, %21, %cst_8 {dimension_numbers = #tpu.dot_dimension_numbers<[1], [1], [0], [0], [0, 0, 1, 0], [], []>} : vector<32x128xbf16>, vector<16x128xbf16>, vector<32x16xf32> -> vector<32x16xf32>
    %cst_9 = arith.constant dense<0.000000e+00> : vector<16xf32>
    %23 = vector.multi_reduction <add>, %18, %cst_9 [1] : vector<16x128xf32> to vector<16xf32>
    %24 = vector.shape_cast %23 : vector<16xf32> to vector<16x1xf32>
    %cst_10 = arith.constant dense<0.000000e+00> : vector<32x32xf32>
    %25 = tpu.matmul %2, %2, %cst_10 {dimension_numbers = #tpu.dot_dimension_numbers<[1], [1], [0], [0], [0, 0, 1, 0], [], []>} : vector<32x128xbf16>, vector<32x128xbf16>, vector<32x32xf32> -> vector<32x32xf32>
    %cst_11 = arith.constant dense<0.000000e+00> : vector<32x32xf32>
    %26 = tpu.matmul %2, %5, %cst_11 {dimension_numbers = #tpu.dot_dimension_numbers<[1], [1], [0], [0], [0, 0, 1, 0], [], []>} : vector<32x128xbf16>, vector<32x128xbf16>, vector<32x32xf32> -> vector<32x32xf32>
    %27 = arith.addf %25, %26 : vector<32x32xf32>
    %cst_12 = arith.constant dense<0.000000e+00> : vector<32x32xf32>
    %28 = tpu.matmul %5, %2, %cst_12 {dimension_numbers = #tpu.dot_dimension_numbers<[1], [1], [0], [0], [0, 0, 1, 0], [], []>} : vector<32x128xbf16>, vector<32x128xbf16>, vector<32x32xf32> -> vector<32x32xf32>
    %29 = arith.addf %27, %28 : vector<32x32xf32>
    %c0_i32 = arith.constant 0 : i32
    %30 = arith.cmpi eq, %arg1, %c0_i32 : i32
    %31 = arith.extui %30 : i1 to i32
    %c0_i32_13 = arith.constant 0 : i32
    %32 = arith.cmpi ne, %31, %c0_i32_13 : i32
    scf.if %32 {
      %c0_17 = arith.constant 0 : index
      %c0_18 = arith.constant 0 : index
      %39 = vector.load %arg8[%c0_17, %c0_18] : memref<32x16xf32, #tpu.memory_space<vmem>>, vector<32x16xf32>
      tpu.vector_store %arg8[%c0_17, %c0_18], %22 {strides = array<i32>} : memref<32x16xf32, #tpu.memory_space<vmem>>, vector<32x16xf32>,
      %c0_19 = arith.constant 0 : index
      %c0_20 = arith.constant 0 : index
      %40 = vector.load %arg7[%c0_19, %c0_20] : memref<32x32xf32, #tpu.memory_space<vmem>>, vector<32x32xf32>
      tpu.vector_store %arg7[%c0_19, %c0_20], %29 {strides = array<i32>} : memref<32x32xf32, #tpu.memory_space<vmem>>, vector<32x32xf32>,
      %c0_21 = arith.constant 0 : index
      %c0_22 = arith.constant 0 : index
      %c0_23 = arith.constant 0 : index
      %41 = vector.load %arg6[%c0_21, %c0_22, %c0_23] : memref<1x16x1xf32, #tpu.memory_space<vmem>>, vector<1x16x1xf32>
      %42 = vector.shape_cast %41 : vector<1x16x1xf32> to vector<16x1xf32>
      %43 = vector.shape_cast %24 : vector<16x1xf32> to vector<1x16x1xf32>
      tpu.vector_store %arg6[%c0_21, %c0_22, %c0_23], %43 {strides = array<i32>} : memref<1x16x1xf32, #tpu.memory_space<vmem>>, vector<1x16x1xf32>,
    } else {
    }
    %c0_i32_14 = arith.constant 0 : i32
    %33 = arith.cmpi sgt, %arg1, %c0_i32_14 : i32
    %34 = arith.extui %33 : i1 to i32
    %c0_i32_15 = arith.constant 0 : i32
    %35 = arith.cmpi ne, %34, %c0_i32_15 : i32
    scf.if %35 {
      %c0_17 = arith.constant 0 : index
      %c0_18 = arith.constant 0 : index
      %39 = vector.load %arg8[%c0_17, %c0_18] : memref<32x16xf32, #tpu.memory_space<vmem>>, vector<32x16xf32>
      %40 = arith.addf %39, %22 : vector<32x16xf32>
      %c0_19 = arith.constant 0 : index
      %c0_20 = arith.constant 0 : index
      %41 = vector.load %arg8[%c0_19, %c0_20] : memref<32x16xf32, #tpu.memory_space<vmem>>, vector<32x16xf32>
      tpu.vector_store %arg8[%c0_19, %c0_20], %40 {strides = array<i32>} : memref<32x16xf32, #tpu.memory_space<vmem>>, vector<32x16xf32>,
      %c0_21 = arith.constant 0 : index
      %c0_22 = arith.constant 0 : index
      %42 = vector.load %arg7[%c0_21, %c0_22] : memref<32x32xf32, #tpu.memory_space<vmem>>, vector<32x32xf32>
      %43 = arith.addf %42, %29 : vector<32x32xf32>
      %c0_23 = arith.constant 0 : index
      %c0_24 = arith.constant 0 : index
      %44 = vector.load %arg7[%c0_23, %c0_24] : memref<32x32xf32, #tpu.memory_space<vmem>>, vector<32x32xf32>
      tpu.vector_store %arg7[%c0_23, %c0_24], %43 {strides = array<i32>} : memref<32x32xf32, #tpu.memory_space<vmem>>, vector<32x32xf32>,
      %c0_25 = arith.constant 0 : index
      %c0_26 = arith.constant 0 : index
      %c0_27 = arith.constant 0 : index
      %45 = vector.load %arg6[%c0_25, %c0_26, %c0_27] : memref<1x16x1xf32, #tpu.memory_space<vmem>>, vector<1x16x1xf32>
      %46 = vector.shape_cast %45 : vector<1x16x1xf32> to vector<16x1xf32>
      %47 = arith.addf %46, %24 : vector<16x1xf32>
      %c0_28 = arith.constant 0 : index
      %c0_29 = arith.constant 0 : index
      %c0_30 = arith.constant 0 : index
      %48 = vector.load %arg6[%c0_28, %c0_29, %c0_30] : memref<1x16x1xf32, #tpu.memory_space<vmem>>, vector<1x16x1xf32>
      %49 = vector.shape_cast %48 : vector<1x16x1xf32> to vector<16x1xf32>
      %50 = vector.shape_cast %47 : vector<16x1xf32> to vector<1x16x1xf32>
      tpu.vector_store %arg6[%c0_28, %c0_29, %c0_30], %50 {strides = array<i32>} : memref<1x16x1xf32, #tpu.memory_space<vmem>>, vector<1x16x1xf32>,
    } else {
    }
    %c1_i32 = arith.constant 1 : i32
    %36 = arith.cmpi eq, %arg1, %c1_i32 : i32
    %37 = arith.extui %36 : i1 to i32
    %c0_i32_16 = arith.constant 0 : i32
    %38 = arith.cmpi ne, %37, %c0_i32_16 : i32
    scf.if %38 {
      %c0_17 = arith.constant 0 : index
      %c0_18 = arith.constant 0 : index
      %39 = vector.load %arg7[%c0_17, %c0_18] : memref<32x32xf32, #tpu.memory_space<vmem>>, vector<32x32xf32>
      %cst_19 = arith.constant dense<0x7F800000> : vector<32xf32>
      %40 = vector.multi_reduction <minimumf>, %39, %cst_19 [1] : vector<32x32xf32> to vector<32xf32>
      %41 = vector.shape_cast %40 : vector<32xf32> to vector<32x1xf32>
      %42 = vector.broadcast %41 : vector<32x1xf32> to vector<32x32xf32>
      %43 = arith.subf %42, %39 : vector<32x32xf32>
      %44 = math.exp %43 : vector<32x32xf32>
      %cst_20 = arith.constant dense<0.000000e+00> : vector<32xf32>
      %45 = vector.multi_reduction <add>, %44, %cst_20 [1] : vector<32x32xf32> to vector<32xf32>
      %46 = vector.shape_cast %45 : vector<32xf32> to vector<32x1xf32>
      %47 = tpu.reciprocal %46 : vector<32x1xf32> -> vector<32x1xf32>
      %48 = vector.broadcast %47 : vector<32x1xf32> to vector<32x32xf32>
      %49 = arith.mulf %44, %48 : vector<32x32xf32>
      %50 = arith.truncf %49 : vector<32x32xf32> to vector<32x32xbf16>
      %c0_21 = arith.constant 0 : index
      %c0_22 = arith.constant 0 : index
      %c0_23 = arith.constant 0 : index
      %51 = vector.load %arg5[%c0_21, %c0_22, %c0_23] : memref<1x32x48xbf16, #tpu.memory_space<vmem>>, vector<1x32x32xbf16>
      %52 = vector.shape_cast %51 : vector<1x32x32xbf16> to vector<32x32xbf16>
      %53 = vector.shape_cast %50 : vector<32x32xbf16> to vector<1x32x32xbf16>
      tpu.vector_store %arg5[%c0_21, %c0_22, %c0_23], %53 {strides = array<i32>} : memref<1x32x48xbf16, #tpu.memory_space<vmem>>, vector<1x32x32xbf16>,
      %c0_24 = arith.constant 0 : index
      %c0_25 = arith.constant 0 : index
      %54 = vector.load %arg8[%c0_24, %c0_25] : memref<32x16xf32, #tpu.memory_space<vmem>>, vector<32x16xf32>
      %55 = arith.truncf %54 : vector<32x16xf32> to vector<32x16xbf16>
      %c0_26 = arith.constant 0 : index
      %c0_27 = arith.constant 0 : index
      %c32 = arith.constant 32 : index
      %56 = vector.load %arg5[%c0_26, %c0_27, %c32] : memref<1x32x48xbf16, #tpu.memory_space<vmem>>, vector<1x32x16xbf16>
      %57 = vector.shape_cast %56 : vector<1x32x16xbf16> to vector<32x16xbf16>
      %58 = vector.shape_cast %55 : vector<32x16xbf16> to vector<1x32x16xbf16>
      tpu.vector_store %arg5[%c0_26, %c0_27, %c32], %58 {strides = array<i32>} : memref<1x32x48xbf16, #tpu.memory_space<vmem>>, vector<1x32x16xbf16>,
    } else {
    }
    return
  }
  func.func @transform_0(%arg0: i32, %arg1: i32) -> (i32, i32, i32) {
    %c0_i32 = arith.constant 0 : i32
    %c0_i32_0 = arith.constant 0 : i32
    return %arg0, %c0_i32, %arg1 : i32, i32, i32
  }
  func.func @transform_1(%arg0: i32, %arg1: i32) -> (i32, i32) {
    %c0_i32 = arith.constant 0 : i32
    %c0_i32_0 = arith.constant 0 : i32
    %c0_i32_1 = arith.constant 0 : i32
    return %c0_i32, %c0_i32_0 : i32, i32
  }
  func.func @transform_2(%arg0: i32, %arg1: i32) -> (i32, i32) {
    %c0_i32 = arith.constant 0 : i32
    %c0_i32_0 = arith.constant 0 : i32
    %c0_i32_1 = arith.constant 0 : i32
    return %c0_i32, %c0_i32_0 : i32, i32
  }
  func.func @transform_3(%arg0: i32, %arg1: i32) -> (i32, i32, i32) {
    %c0_i32 = arith.constant 0 : i32
    %c0_i32_0 = arith.constant 0 : i32
    %c0_i32_1 = arith.constant 0 : i32
    return %arg0, %c0_i32, %c0_i32_0 : i32, i32, i32
  }
  func.func @transform_4(%arg0: i32, %arg1: i32) -> (i32, i32, i32) {
    %c0_i32 = arith.constant 0 : i32
    %c0_i32_0 = arith.constant 0 : i32
    %c0_i32_1 = arith.constant 0 : i32
    return %arg0, %c0_i32, %c0_i32_0 : i32, i32, i32
  }
}

</mosaic_0001>

<bundles_post_ra>
// kernel: tpu_custom_call.1
= control target key start
LH: loop header
LB: loop body
LE: loop exit
PB: predicated region body
PF: predicated region fallthrough
CT: control target
= control target key end

     0   :  { %s1679_s0 = inlined_call_operand.hbm [shape: f32[2,32,256], index: 0, kind: input, shape index: {}]   ;;  %s1680_s1 = inlined_call_operand.vmem [shape: bf16[48,32], index: 1, kind: input, shape index: {}]   ;;  %s1681_s2 = inlined_call_operand.vmem [shape: f32[48,1], index: 2, kind: input, shape index: {}]   ;;  %s1682_s3 = inlined_call_operand.hbm [shape: bf16[2,32,48], index: 3, kind: output, shape index: {0}]   ;;  %s1683_s4 = inlined_call_operand.vmem [shape: f32[2,16,1], index: 4, kind: output, shape index: {1}]  }
   0x1   :  { %1688 = sst [smem:[#allocation14_spill]] %s1682_s3 }
   0x2   :  { %10 = vsyncpa [#allocation5], 0 }
   0x3   :  { %12 = vsyncpa [#allocation5 + $0x1], 0 }
   0x4   :  { %13 = vsyncpa [#allocation6], 0 }
   0x5   :  { %15 = vsyncpa [#allocation6 + $0x1], 0  ;;  %s1347_s15 = smov 0   ;;  %s1349_s16 = smov 0  }
   0x6   :  { %s1351_s17 = smov 0   ;;  %s1353_s18 = smov 0  }
   0x7   :  { %s1355_s19 = smov 0   ;;  %s1357_s20 = smov 0  }
   0x8   :  { %s1359_s21 = smov 0   ;;  %s1361_s22 = smov 0  }
   0x9   :  { %s1363_s23 = smov 0   ;;  %s1365_s24 = smov 0  }
   0xa   :  { %s1367_s25 = smov 0  }
   0xb LB: > { %1689 = sst [smem:[#allocation10_spill]] %s1289_s20  ;;  %s911_s26 = sadd.s32 4294967295, %s1309_s25   ;;  %s1309_s25 = sphi %s1367_s25, %s21_s25   ;;  %s1305_s24 = sphi %s1365_s24, %s1711_s24   ;;  %s1301_s23 = sphi %s1363_s23, %s1710_s23   ;;  %s1297_s22 = sphi %s1361_s22, %s1709_s22   ;;  %s1293_s21 = sphi %s1359_s21, %s1708_s21   ;;  %s1289_s20 = sphi %s1357_s20, %s1700_s20   ;;  %s1285_s19 = sphi %s1355_s19, %s1707_s19   ;;  %s1281_s18 = sphi %s1353_s18, %s1706_s18   ;;  %s1277_s17 = sphi %s1351_s17, %s1705_s17   ;;  %s1273_s16 = sphi %s1349_s16, %s1704_s16   ;;  %s1269_s15 = sphi %s1347_s15, %s1703_s15  }
   0xc   : > { %s912_s27 = sadd.s32 4294967294, %s1309_s25   ;;  %s30_s28 = sadd.s32 1, %s1301_s23 }
   0xd   : > { %s33_s29 = sadd.s32 1, %s1305_s24  ;;  %p31_p0 = scmp.ge.s32.totalorder %s30_s28, 2 }
   0xe   : > { %s42_s30 = sadd.s32 1, %s1289_s20  ;;  %p49_p1 = scmp.ne.s32.totalorder %s1289_s20, %s1285_s19 }
   0xf   : > { %p50_p2 = scmp.eq.s32.totalorder %s1309_s25, 0  ;;  %s1713_s28 = smov (%p31_p0, %s30_s28), 0 }
  0x10   : > { %1690 = sst [smem:[#allocation11_spill]] %s1713_s28  ;;  %s1715_s29 = smov (!%p31_p0, %s33_s29), %s1305_s24 }
  0x11   : > { %s38_s5 = ssub.s32 %s1301_s23, %s1713_s28  ;;  %p1413_p3 = por %p50_p2, %p49_p1 }
  0x12   : > { %p35_p4 = scmp.ge.s32.totalorder %s1715_s29, 2  ;;  %p55_p5 = scmp.ne.s32.totalorder %s1285_s19, %s1281_s18 }
  0x13   : > { %p56_p6 = scmp.eq.s32.totalorder %s911_s26, 0  ;;  %s110_s7 = sadd.s32 1, %s1277_s17 }
  0x14   : > { %s1717_s29 = smov (%p35_p4, %s1715_s29), 0  ;;  %p120_p8 = scmp.ne.s32.totalorder %s1277_s17, %s1273_s16 }
  0x15   : > { %1692 = sst [smem:[#allocation12_spill]] %s1717_s29  ;;  %p1421_p7 = por %p56_p6, %p55_p5 }
  0x16   : > { %s37_s9 = ssub.s32 %s1305_s24, %s1717_s29  ;;  %p121_p9 = scmp.eq.s32.totalorder %s911_s26, 3 }
  0x17   : > { %s39_s10 = sor.u32 %s38_s5, %s37_s9  ;;  %p108_p10 = scmp.eq.s32.totalorder %s37_s9, 0 }
  0x18   : > { %p40_p11 = scmp.eq.s32.totalorder %s39_s10, 0  ;;  %p1429_p12 = por %p121_p9, %p120_p8 }
  0x19   : > { %s1434_s12 = scalar_select %p108_p10, %s1277_s17, %s110_s7  }
  0x1a   : > { %s1437_s13 = scalar_select %p40_p11, %s1289_s20, %s42_s30  }
  0x1b   : > { %p126_p13 = scmp.ne.s32.totalorder %s1273_s16, %s1269_s15  ;;  %p127_p0 = scmp.eq.s32.totalorder %s912_s27, 3 }
  0x1c   : > { %1695 = sst [smem:[#allocation13_spill]] %s1437_s13  ;;  %p1033_p1 = scmp.lt.s32.totalorder %s1309_s25, 4 }
  0x1d   : > { %p1442_p2 = por %p127_p0, %p126_p13  ;;  %s179_s18 = sand.u32 1, %s1289_s20  }
  0x1e   : > { %s915_s26 = sshll.u32 %s179_s18, 5  ;;  %s916_s5 = sshll.u32 %s1305_s24, 3 }
  0x1f   : > { %s188_s9 = sadd.s32 %s1301_s23, %s916_s5  ;;  %s183_s10 = scalar_lea.vmem [#allocation4], %s915_s26 }
  0x20   : > { %s191_s29 = sshll.u32 %s183_s10, 4  ;;  %s917_s28 = sshll.u32 %s188_s9, 7  ;;  %s192_s29 = int_to_ptr.vmem [resolvable:$true] %s191_s29 }
  0x21   : > { %s190_s30 = scalar_lea.hbm %s1679_s0, %s917_s28  ;;  %p1454_p4 = pnand %p1033_p1, %p1413_p3 }
  0x22   : > { %s180_s13 = scalar_lea.sflag [#allocation5], %s179_s18  ;;  %s1174_s20 = scalar_lea.vmem %s192_s29, 512 }
  0x23   : > { %p1163_p5 = pneg %p1454_p4  ;;  %p1175_p6 = scmp.ne.s32.totalorder %s192_s29, %s1174_s20 }
  0x24   : > { %s1311_s26 = smov [#allocation4]  }
  0x25   : > { %p1177_p8 = pnand %p1175_p6, %p1163_p5  ;;  %s1179_s5 = sshll.u32 %s1311_s26, 4  ;;  %s1180_s5 = int_to_ptr.vmem [resolvable:$false] %s1179_s5 }
  0x26   : > { %s1181_s9 = scalar_lea.vmem %s1180_s5, 1024  ;;  %p1182_p10 = scmp.lt.s32.totalorder %s192_s29, %s1180_s5 }
  0x27   : > { %p1178_p9 = pneg %p1177_p8  ;;  %p1183_p11 = scmp.lt.s32.totalorder %s1181_s9, %s1174_s20 }
  0x29   : > { %p1184_p13 = por %p1183_p11, %p1182_p10 }
  0x2b   : > { %p1185_p0 = pnand %p1184_p13, %p1178_p9 }
  0x2d   : > { %1188 = shalt.err (!%p1185_p0)
}
  0x2e   : > { %s1312_s3 = smov 256   ;;  %s1313_s28 = smov 128  }
  0x2f   : > { %s1314_s6 = smov 8   ;;  %p918_p3 = scmp.ge.s32.totalorder %s1309_s25, 1 }
  0x30   : > { %1028 = dma.hbm_to_vmem [thread:$0]  (!%p1454_p4), %s190_s30, 512, %s192_s29, %s180_s13, %s1312_s3, %s1313_s28, %s1314_s6  }
  0x31   : > { %p199_p1 = scmp.lt.s32.totalorder %s1309_s25, 5 }
  0x33   : > { %p200_p5 = pnand %p918_p3, %p199_p1 }
  0x34   : > { %s205_s18 = sand.u32 (!%p200_p5), 1, %s1285_s19  }
  0x35   : > { %203 = sbr.rel (%p200_p5) target bundleno = 978 (0x3d2), region = 32  ;;  %s919_s10 = sshll.u32 (!%p200_p5), %s205_s18, 5 }
  0x36   : > { %s206_s20 = scalar_lea.sflag (!%p200_p5), [#allocation5], %s205_s18  ;;  %s209_s7 = scalar_lea.vmem (!%p200_p5), [#allocation4], %s919_s10 }
  0x3a   : > { %1260 = dma.done.wait (%p1421_p7), %s206_s20, 512  }
  0x3b   : > { %1262 = vsyncadd (%p1421_p7), %s206_s20, 4294966784  ;;  %s229_s29 = sand.u32 1, %s1273_s16   ;;  %p239_p4 = scmp.lt.s32.totalorder %s1297_s22, 1  ;;  %v1315_v0 = vmov 0.0   ;;  %vm1316_vm0 = vmmov 0   ;;  %v1317_v1 = vmov 0  }
  0x3c   : > { %s1473_s13 = sshll.u32 %s229_s29, 4  ;;  %975 = vmatprep.subr.bf16.mxu0 %v1315_v0  ;;  %979 = vmatprep.mubr.msk.bf16.mxu0 %vm1316_vm0, %v1315_v0  ;;  %v1482_v2 = vld [vmem:[%s209_s7 + $0x10] sm:$0xff]  ;;  %v1484_v3 = vld [vmem:[%s209_s7 + $0x18] sm:$0xff]  ;;  %v1486_v4 = vld [vmem:[%s209_s7] sm:$0xff]  ;;  %vm318_vm1 = vcmask 261120   ;;  %p929_p7 = scmp.ne.s32.totalorder %s1293_s21, 0 }
  0x3d   : > { %1132 = vset.pattern.permute.xlu0 %v1317_v1  ;;  %1133 = vset.pattern.permute.xlu1 %v1317_v1  ;;  %s240_s30 = scalar_select %p239_p4, %s1297_s22, 1  ;;  %v1490_v5 = vpack.c.bf16 %v1484_v3, %v1482_v2  ;;  %v1492_v6 = vld [vmem:[%s209_s7 + $0x8] sm:$0xff]  ;;  %v267_v8 = vld [vmem:[%s1681_s2] sm:$0xff]  ;;  %v269_v9 = vld [vmem:[%s1681_s2 + $0x10] sm:$0xff] }
  0x3e   : > { %v1497_v7 = vpack.c.bf16 %v1492_v6, %v1486_v4  ;;  %275 = vperm.xlu0 %1132, %v267_v8   ;;  %v1134_v10 = vld [vmem:[%s1680_s1] sm:$0xff]   ;;  %v268_v11 = vld [vmem:[%s1681_s2 + $0x8] sm:$0xff]  ;;  %285 = vperm.xlu1 %1133, %v269_v9   ;;  %v270_v12 = vld [vmem:[%s1681_s2 + $0x18] sm:$0xff]  ;;  %s1557_s20 = scalar_lea.vmem [#allocation7], %s1473_s13 }
  0x3f   : > { %s945_s8 = sshll.u32 %s240_s30, 4  ;;  %976 = vmatpush3.bf16.msra.mxu0 %v1490_v5  ;;  %v271_v13 = vld [vmem:[%s1681_s2 + $0x20] sm:$0xff]  ;;  %v272_v14 = vld [vmem:[%s1681_s2 + $0x28] sm:$0xff]  ;;  %v1136_v16 = vld [vmem:[%s1680_s1 + $0x10] sm:$0xff]   ;;  %v253_v51 = vunpack.c.l.bf16 %v1490_v5  ;;  %v254_v55 = vunpack.c.h.bf16 %v1490_v5 }
  0x40   : > { %s1480_s5 = scalar_lea.vmem %s1683_s4, %s945_s8  ;;  %977 = vmatprep.subr.bf16.mxu0 %v1315_v0  ;;  %v1135_v15 = vld [vmem:[%s1680_s1 + $0x8] sm:$0xff]  }
  0x41   : > { %v257_v62 = vsub.f32 %v1482_v2, %v253_v51  ;;  %v258_v63 = vsub.f32 %v1484_v3, %v254_v55 }
  0x42   : > { %280 = vperm.xlu0 %1132, %v268_v11   ;;  %290 = vperm.xlu1 %1133, %v270_v12   ;;  %v252_v11 = vunpack.c.h.bf16 %v1497_v7 }
  0x43   : > { %978 = vmatpush3.bf16.msra.mxu0 %v1497_v7  ;;  %v260_v9 = vpack.c.bf16 %v258_v63, %v257_v62 }
  0x44   : > { %1005 = vmatprep.subr.bf16.mxu0 %v1490_v5  ;;  %v256_v3 = vsub.f32 %v1492_v6, %v252_v11 }
  0x46   : > { %980 = vmatmul.mubr.msk.bf16.vlgmr.msra.gmra.mxu0 %vm318_vm1, %v1134_v10  ;;  %295 = vperm.xlu0 %1132, %v271_v13   ;;  %v251_v10 = vunpack.c.l.bf16 %v1497_v7 }
  0x47   : > { %983 = vmatprep.mubr.msk.bf16.mxu0 %vm1316_vm0, %v1315_v0  ;;  %1006 = vmatpush3.bf16.xpose.msra.mxu0 %v1490_v5 }
  0x48   : > { %1007 = vmatprep.subr.bf16.mxu0 %v1497_v7  ;;  %300 = vperm.xlu1 %1133, %v272_v14   ;;  %v255_v2 = vsub.f32 %v1486_v4, %v251_v10 }
  0x4e   : > { %984 = vmatmul.mubr.msk.bf16.gmra.mxu0 %vm318_vm1, %v1135_v15 }
  0x4f   : > { %987 = vmatprep.mubr.msk.bf16.mxu0 %vm1316_vm0, %v1315_v0  ;;  %1008 = vmatpush3.bf16.xpose.msra.mxu0 %v1497_v7 }
  0x56   : > { %988 = vmatmul.mubr.msk.bf16.gmra.mxu0 %vm318_vm1, %v1136_v16 }
  0x57   : > { %1009 = vmatprep.mubr.bf16.mxu0 %v1497_v7 }
  0x5e   : > { %1010 = vmatmul.mubr.bf16.vlgmr.msra.gmra.mxu0 %v1490_v5 }
  0xb9   : > { %v276_v17 = vpop.permute.xlu0 %275  ;;  %v286_v27 = vpop.permute.xlu1 %285 }
  0xbd   : > { %v281_v22 = vpop.permute.xlu0 %280  ;;  %v291_v34 = vpop.permute.xlu1 %290 }
  0xc1   : > { %v296_v14 = vpop.permute.xlu0 %295 }
  0xc3   : > { %v301_v12 = vpop.permute.xlu1 %300 }
 0x106   : > { %v362_v18 = vpop.f32.mrf.mxu0 }
 0x107   : > { %v363_v19 = vadd.f32 %v362_v18, %v276_v17  ;;  %v259_v17 = vpack.c.bf16 %v256_v3, %v255_v2 }
 0x108   : > { %v981_v20 = vpop.f32.mrf.mxu0 }
 0x109   : > { %v387_v21 = vmin.f32 %v363_v19, 20.0  ;;  %vm385_vm3 = vcmp.gt.f32.partialorder %v363_v19, 20.0 }
 0x10a   : > { %v365_v23 = vpop.f32.mrf.mxu0 }
 0x10b   : > { %v389_v24 = vmul.f32 1.442695, %v387_v21  ;;  %v366_v25 = vadd.f32 %v365_v23, %v281_v22 }
 0x10c   : > { %v982_v26 = vpop.f32.mrf.mxu0 }
 0x10d   : > { %1137 = vpow2.f32 %v389_v24  ;;  %v388_v28 = vmin.f32 %v366_v25, 20.0  ;;  %vm386_vm5 = vcmp.gt.f32.partialorder %v366_v25, 20.0 }
 0x10e   : > { %v370_v29 = vpop.f32.mrf.mxu0 }
 0x10f   : > { %v391_v30 = vmul.f32 1.442695, %v388_v28  ;;  %v371_v32 = vadd.f32 %v370_v29, %v286_v27 }
 0x110   : > { %v985_v31 = vpop.f32.mrf.mxu0 }
 0x111   : > { %1139 = vpow2.f32 %v391_v30 }
 0x112   : > { %v373_v33 = vpop.f32.mrf.mxu0 }
 0x113   : > { %v374_v35 = vadd.f32 %v373_v33, %v291_v34 }
 0x114   : > { %v986_v36 = vpop.f32.mrf.mxu0 }
 0x115   : > { %v413_v37 = vpack.c.bf16 %v374_v35, %v371_v32 }
 0x116   : > { %v378_v38 = vpop.f32.mrf.mxu0 }
 0x117   : > { %993 = vmatprep.mubr.bf16.mxu1 %v413_v37  ;;  %v379_v15 = vadd.f32 %v378_v38, %v296_v14 }
 0x118   : > { %v989_v39 = vpop.f32.mrf.mxu0 }
 0x11a   : > { %v1138_v40 = vpop.eup %1137  ;;  %v381_v41 = vpop.f32.mrf.mxu0 }
 0x11b   : > { %v393_v42 = vadd.f32 1.0, %v1138_v40  ;;  %v396_v46 = vmul.f32 -0.5, %v1138_v40  ;;  %v399_v49 = vand.u32 2147483647, %v1138_v40  ;;  %v382_v13 = vadd.f32 %v381_v41, %v301_v12 }
 0x11c   : > { %v990_v43 = vpop.f32.mrf.mxu0 }
 0x11d   : > { %1141 = vlog2.f32 %v393_v42  ;;  %v397_v47 = vadd.f32 1.0, %v396_v46  ;;  %vm400_vm2 = vcmp.lt.f32.partialorder %v399_v49, 0.0004427343  ;;  %v414_v16 = vpack.c.bf16 %v382_v13, %v379_v15 }
 0x11e   : > { %v1140_v44 = vpop.eup %1139  ;;  %v1011_v23 = vpop.f32.mrf.mxu0 }
 0x11f   : > { %v402_v45 = vadd.f32 1.0, %v1140_v44  ;;  %v405_v48 = vmul.f32 -0.5, %v1140_v44  ;;  %v398_v53 = vmul.f32 %v1138_v40, %v397_v47  ;;  %v408_v56 = vand.u32 2147483647, %v1140_v44 }
 0x121   : > { %1143 = vlog2.f32 %v402_v45  ;;  %v406_v54 = vadd.f32 1.0, %v405_v48  ;;  %vm409_vm4 = vcmp.lt.f32.partialorder %v408_v56, 0.0004427343 }
 0x123   : > { %v407_v61 = vmul.f32 %v1140_v44, %v406_v54 }
 0x12a   : > { %v1142_v50 = vpop.eup %1141 }
 0x12b   : > { %v395_v52 = vmul.f32 0.6931472, %v1142_v50 }
 0x12d   : > { %v401_v57 = vsel %vm400_vm2, %v398_v53, %v395_v52 }
 0x12e   : > { %v1144_v58 = vpop.eup %1143  ;;  %v411_v59 = vsel %vm385_vm3, %v363_v19, %v401_v57 }
 0x12f   : > { %465 = vadd.xlane.f32.xlu0 %v411_v59  ;;  %v404_v60 = vmul.f32 0.6931472, %v1144_v58 }
 0x131   : > { %v410_v0 = vsel %vm409_vm4, %v407_v61, %v404_v60 }
 0x132   : > { %v412_v1 = vsel %vm386_vm5, %v366_v25, %v410_v0  ;;  %v552_v25 = vpop.f32.mrf.mxu0 }
 0x133   : > { %467 = vadd.xlane.f32.xlu1 %v412_v1  ;;  %v415_v8 = vpack.c.bf16 %v412_v1, %v411_v59 }
 0x135   : > { %991 = vmatprep.subr.bf16.mxu1 %v415_v8 }
 0x136   : > { %992 = vmatpush3.bf16.xpose.msra.mxu1 %v415_v8 }
 0x137   : > { %997 = vmatprep.subr.bf16.mxu1 %v260_v9 }
 0x13d   : > { %994 = vmatmul.mubr.bf16.vlgmr.msra.gmra.mxu1 %v414_v16 }
 0x13e   : > { %998 = vmatpush3.bf16.xpose.msra.mxu1 %v260_v9  ;;  %1001 = vmatprep.mubr.bf16.mxu1 %v1497_v7 }
 0x13f   : > { %999 = vmatprep.subr.bf16.mxu1 %v259_v17 }
 0x146   : > { %1000 = vmatpush3.bf16.xpose.msra.mxu1 %v259_v17 }
 0x147   : > { %1013 = vmatprep.subr.bf16.mxu1 %v1490_v5 }
 0x14d   : > { %1002 = vmatmul.mubr.bf16.vlgmr.msra.gmra.mxu1 %v1490_v5 }
 0x14e   : > { %1014 = vmatpush3.bf16.xpose.msra.mxu1 %v1490_v5  ;;  %1017 = vmatprep.mubr.bf16.mxu1 %v259_v17  ;;  %v1012_v5 = vpop.f32.mrf.mxu0 }
 0x14f   : > { %1015 = vmatprep.subr.bf16.mxu1 %v1497_v7 }
 0x150   : > { %v555_v31 = vpop.f32.mrf.mxu0 }
 0x156   : > { %1016 = vmatpush3.bf16.xpose.msra.mxu1 %v1497_v7 }
 0x15d   : > { %1018 = vmatmul.mubr.bf16.vlgmr.msra.gmra.mxu1 %v260_v9 }
 0x1b8   : > { %v1552_v4 = vpop.xlane.xlu0 %465 }
 0x1bc   : > { %v1554_v6 = vpop.xlane.xlu1 %467 }
 0x1fd   : > { %v995_v18 = vpop.f32.mrf.mxu1 }
 0x1ff   : > { %v450_v19 = vpop.f32.mrf.mxu1 }
 0x201   : > { %v996_v20 = vpop.f32.mrf.mxu1 }
 0x203   : > { %v453_v21 = vpop.f32.mrf.mxu1 }
 0x20d   : > { %v1003_v22 = vpop.f32.mrf.mxu1 }
 0x20e   : > { %v561_v28 = vadd.f32 %v1011_v23, %v1003_v22 }
 0x20f   : > { %v503_v24 = vpop.f32.mrf.mxu1 }
 0x210   : > { %v553_v7 = vadd.f32 %v552_v25, %v503_v24 }
 0x211   : > { %v1004_v26 = vpop.f32.mrf.mxu1 }
 0x212   : > { %v564_v33 = vadd.f32 %v1012_v5, %v1004_v26 }
 0x213   : > { %v506_v27 = vpop.f32.mrf.mxu1 }
 0x214   : > { %v556_v36 = vadd.f32 %v555_v31, %v506_v27 }
 0x21d   : > { %v1019_v29 = vpop.f32.mrf.mxu1 }
 0x21e   : > { %v618_v30 = vadd.f32 %v1019_v29, %v561_v28 }
 0x21f   : > { %v601_v32 = vpop.f32.mrf.mxu1 }
 0x220   : > { %v616_v34 = vadd.f32 %v601_v32, %v553_v7  ;;  %623 = sbr.rel (%p929_p7) target bundleno = 554 (0x22a), region = 40 }
 0x221   : > { %v1020_v35 = vpop.f32.mrf.mxu1 }
 0x222   : > { %v619_v37 = vadd.f32 %v1020_v35, %v564_v33 }
 0x223   : > { %v604_v38 = vpop.f32.mrf.mxu1 }
 0x224   : > { %v617_v39 = vadd.f32 %v604_v38, %v556_v36 }
 0x225   : > { %vm624_vm6 = vcmask 130048   ;;  %629 = vst.msk [vmem:[#allocation2] sm:$0xff] %vm318_vm1, %v616_v34  ;;  %631 = vst.msk [vmem:[#allocation2 + $0x10] sm:$0xff] %vm318_vm1, %v618_v30  ;;  %vm633_vm7 = vcmask 7168  }
 0x226   : > { %630 = vst.msk [vmem:[#allocation2 + $0x8] sm:$0xff] %vm318_vm1, %v617_v39  ;;  %632 = vst.msk [vmem:[#allocation2 + $0x18] sm:$0xff] %vm318_vm1, %v619_v37 }
 0x227   : > { %625 = vst.msk [vmem:[#allocation3] sm:$0xff] %vm624_vm6, %v450_v19  ;;  %626 = vst.msk [vmem:[#allocation3 + $0x8] sm:$0xff] %vm624_vm6, %v453_v21 }
 0x228   : > { %627 = vst.msk [vmem:[#allocation3 + $0x10] sm:$0xff] %vm624_vm6, %v995_v18  ;;  %628 = vst.msk [vmem:[#allocation3 + $0x18] sm:$0xff] %vm624_vm6, %v996_v20 }
 0x229   : > { %634 = vst.msk [vmem:[%s1480_s5] sm:$0xff] %vm633_vm7, %v1552_v4  ;;  %635 = vst.msk [vmem:[%s1480_s5 + $0x8] sm:$0xff] %vm633_vm7, %v1554_v6 }
 0x22a PF: > { %p930_p6 = scmp.le.s32.totalorder %s1293_s21, 0 }
 0x22c   : > { %639 = sbr.rel (%p930_p6) target bundleno = 569 (0x239), region = 44 }
 0x231   : > { %v640_v40 = vld [vmem:[#allocation3] sm:$0xff]  ;;  %vm648_vm8 = vcmask 130048   ;;  %v641_v41 = vld [vmem:[#allocation3 + $0x8] sm:$0xff]  ;;  %v642_v42 = vld [vmem:[#allocation3 + $0x10] sm:$0xff]  ;;  %vm669_vm9 = vcmask 7168  }
 0x232   : > { %v644_v43 = vadd.f32 %v640_v40, %v450_v19  ;;  %v645_v44 = vadd.f32 %v641_v41, %v453_v21  ;;  %v646_v45 = vadd.f32 %v995_v18, %v642_v42  ;;  %v643_v46 = vld [vmem:[#allocation3 + $0x18] sm:$0xff]  ;;  %v653_v47 = vld [vmem:[#allocation2] sm:$0xff]  ;;  %v654_v48 = vld [vmem:[#allocation2 + $0x8] sm:$0xff] }
 0x233   : > { %v647_v49 = vadd.f32 %v996_v20, %v643_v46  ;;  %v657_v50 = vadd.f32 %v653_v47, %v616_v34  ;;  %v658_v51 = vadd.f32 %v654_v48, %v617_v39  ;;  %v655_v52 = vld [vmem:[#allocation2 + $0x10] sm:$0xff]  ;;  %v656_v53 = vld [vmem:[#allocation2 + $0x18] sm:$0xff]  ;;  %v665_v54 = vld [vmem:[%s1480_s5] sm:$0xff] }
 0x234   : > { %649 = vst.msk [vmem:[#allocation3] sm:$0xff] %vm648_vm8, %v644_v43  ;;  %650 = vst.msk [vmem:[#allocation3 + $0x8] sm:$0xff] %vm648_vm8, %v645_v44  ;;  %v659_v55 = vadd.f32 %v655_v52, %v618_v30  ;;  %v660_v56 = vadd.f32 %v656_v53, %v619_v37  ;;  %v667_v57 = vadd.f32 %v665_v54, %v1552_v4  ;;  %v666_v58 = vld [vmem:[%s1480_s5 + $0x8] sm:$0xff] }
 0x235   : > { %651 = vst.msk [vmem:[#allocation3 + $0x10] sm:$0xff] %vm648_vm8, %v646_v45  ;;  %652 = vst.msk [vmem:[#allocation3 + $0x18] sm:$0xff] %vm648_vm8, %v647_v49  ;;  %v668_v59 = vadd.f32 %v666_v58, %v1554_v6 }
 0x236   : > { %661 = vst.msk [vmem:[#allocation2] sm:$0xff] %vm318_vm1, %v657_v50  ;;  %662 = vst.msk [vmem:[#allocation2 + $0x8] sm:$0xff] %vm318_vm1, %v658_v51 }
 0x237   : > { %663 = vst.msk [vmem:[#allocation2 + $0x10] sm:$0xff] %vm318_vm1, %v659_v55  ;;  %664 = vst.msk [vmem:[#allocation2 + $0x18] sm:$0xff] %vm318_vm1, %v660_v56 }
 0x238   : > { %670 = vst.msk [vmem:[%s1480_s5] sm:$0xff] %vm669_vm9, %v667_v57  ;;  %671 = vst.msk [vmem:[%s1480_s5 + $0x8] sm:$0xff] %vm669_vm9, %v668_v59 }
 0x239 PF: > { %p931_p8 = scmp.ne.s32.totalorder %s1293_s21, 1 }
 0x23a   : > { %s1318_s21 = smov (!%p931_p8), 32  }
 0x23b   : > { %675 = sbr.rel (%p931_p8) target bundleno = 954 (0x3ba), region = 48 }
 0x240   : > { %v676_v60 = vld [vmem:[#allocation2] sm:$0xff]  ;;  %v678_v61 = vld [vmem:[#allocation2 + $0x10] sm:$0xff]  ;;  %v677_v62 = vld [vmem:[#allocation2 + $0x8] sm:$0xff]  ;;  %vm740_vm10 = vcmask 257024   ;;  %vm773_vm11 = vcmask 388352  }
 0x241   : > { %v680_v63 = vsel %vm318_vm1, %v676_v60, inf  ;;  %v686_v0 = vsel %vm318_vm1, %v678_v61, inf  ;;  %v679_v1 = vld [vmem:[#allocation2 + $0x18] sm:$0xff]  ;;  %v683_v8 = vsel %vm318_vm1, %v677_v62, inf  ;;  %v746_v21 = vld [vmem:[#allocation3 + $0x8] sm:$0xff]  ;;  %v747_v23 = vld [vmem:[#allocation3 + $0x10] sm:$0xff] }
 0x242   : > { %681 = vmin.xlane.f32.xlu0 %v680_v63  ;;  %687 = vmin.xlane.f32.xlu1 %v686_v0  ;;  %v689_v9 = vsel %vm318_vm1, %v679_v1, inf  ;;  %v951_v22 = vpack.c.bf16 %v746_v21, %v746_v21  ;;  %v745_v24 = vld [vmem:[#allocation3] sm:$0xff]  ;;  %v952_v25 = vpack.c.bf16 %v747_v23, %v747_v23  ;;  %v748_v30 = vld [vmem:[#allocation3 + $0x18] sm:$0xff] }
 0x243   : > { %v950_v26 = vpack.c.bf16 %v745_v24, %v745_v24  ;;  %v953_v31 = vpack.c.bf16 %v748_v30, %v748_v30 }
 0x246   : > { %684 = vmin.xlane.f32.xlu0 %v683_v8  ;;  %690 = vmin.xlane.f32.xlu1 %v689_v9 }
 0x2cb   : > { %v682_v10 = vpop.xlane.xlu0 %681  ;;  %v688_v11 = vpop.xlane.xlu1 %687 }
 0x2cc   : > { %v692_v12 = vsub.f32 %v682_v10, %v676_v60  ;;  %v694_v13 = vsub.f32 %v688_v11, %v678_v61 }
 0x2ce   : > { %v696_v2 = vmul.f32 1.442695, %v692_v12  ;;  %v700_v3 = vmul.f32 1.442695, %v694_v13 }
 0x2cf   : > { %v685_v14 = vpop.xlane.xlu0 %684  ;;  %v691_v5 = vpop.xlane.xlu1 %690 }
 0x2d0   : > { %1145 = vpow2.f32 %v696_v2  ;;  %v693_v15 = vsub.f32 %v685_v14, %v677_v62  ;;  %v695_v27 = vsub.f32 %v691_v5, %v679_v1 }
 0x2d1   : > { %1147 = vpow2.f32 %v700_v3 }
 0x2d2   : > { %v698_v16 = vmul.f32 1.442695, %v693_v15  ;;  %v702_v28 = vmul.f32 1.442695, %v695_v27 }
 0x2d4   : > { %1149 = vpow2.f32 %v698_v16 }
 0x2d5   : > { %1151 = vpow2.f32 %v702_v28 }
 0x2dd   : > { %v1146_v17 = vpop.eup %1145 }
 0x2de   : > { %v1148_v4 = vpop.eup %1147  ;;  %v704_v6 = vsel %vm318_vm1, %v1146_v17, 0.0 }
 0x2df   : > { %705 = vadd.xlane.f32.xlu0 %v704_v6  ;;  %v710_v18 = vsel %vm318_vm1, %v1148_v4, 0.0 }
 0x2e1   : > { %v1150_v19 = vpop.eup %1149 }
 0x2e2   : > { %v707_v20 = vsel %vm318_vm1, %v1150_v19, 0.0  ;;  %v1152_v29 = vpop.eup %1151 }
 0x2e3   : > { %711 = vadd.xlane.f32.xlu0 %v710_v18  ;;  %708 = vadd.xlane.f32.xlu1 %v707_v20  ;;  %v713_v7 = vsel %vm318_vm1, %v1152_v29, 0.0 }
 0x2f4   : > { %763 = vrot.lane.b32.xlu1 %v951_v22, %s1318_s21 }
 0x2f8   : > { %765 = vrot.lane.b32.xlu1 %v952_v25, %s1318_s21 }
 0x2f9   : > { %761 = vrot.lane.b32.xlu0 %v950_v26, %s1318_s21 }
 0x31c   : > { %714 = vadd.xlane.f32.xlu1 %v713_v7 }
 0x32d   : > { %767 = vrot.lane.b32.xlu1 %v953_v31, %s1318_s21 }
 0x368   : > { %v706_v32 = vpop.xlane.xlu0 %705 }
 0x369   : > { %1153 = vrcp.f32 %v706_v32 }
 0x36c   : > { %v709_v33 = vpop.xlane.xlu1 %708  ;;  %v712_v34 = vpop.xlane.xlu0 %711 }
 0x36d   : > { %1155 = vrcp.f32 %v709_v33 }
 0x36e   : > { %1157 = vrcp.f32 %v712_v34 }
 0x370   : > { %v762_v38 = vpop.permute.xlu0 %761  ;;  %v764_v40 = vpop.permute.xlu1 %763 }
 0x374   : > { %v766_v46 = vpop.permute.xlu1 %765 }
 0x376   : > { %v1154_v35 = vpop.eup %1153 }
 0x377   : > { %v720_v36 = vmul.f32 %v1154_v35, %v1146_v17 }
 0x379   : > { %v946_v37 = vpack.c.bf16 %v720_v36, %v720_v36 }
 0x37a   : > { %v1156_v39 = vpop.eup %1155 }
 0x37b   : > { %v1158_v41 = vpop.eup %1157  ;;  %v721_v42 = vmul.f32 %v1156_v39, %v1150_v19  ;;  %741 = vst.msk [vmem:[%s1557_s20] sm:$0xf] %vm740_vm10, %v946_v37 }
 0x37c   : > { %v722_v43 = vmul.f32 %v1158_v41, %v1148_v4  ;;  %774 = vst.msk [vmem:[%s1557_s20] sm:$0xf] %vm773_vm11, %v762_v38 }
 0x37d   : > { %v947_v44 = vpack.c.bf16 %v721_v42, %v721_v42 }
 0x37e   : > { %v948_v45 = vpack.c.bf16 %v722_v43, %v722_v43 }
 0x37f   : > { %742 = vst.msk [vmem:[%s1557_s20 + $0x4] sm:$0xf] %vm740_vm10, %v947_v44 }
 0x380   : > { %775 = vst.msk [vmem:[%s1557_s20 + $0x4] sm:$0xf] %vm773_vm11, %v764_v40 }
 0x381   : > { %743 = vst.msk [vmem:[%s1557_s20 + $0x8] sm:$0xf] %vm740_vm10, %v948_v45 }
 0x382   : > { %776 = vst.msk [vmem:[%s1557_s20 + $0x8] sm:$0xf] %vm773_vm11, %v766_v46 }
 0x3a5   : > { %v715_v47 = vpop.xlane.xlu1 %714 }
 0x3a6   : > { %1159 = vrcp.f32 %v715_v47 }
 0x3a9   : > { %v768_v51 = vpop.permute.xlu1 %767 }
 0x3b3   : > { %v1160_v48 = vpop.eup %1159 }
 0x3b4   : > { %v723_v49 = vmul.f32 %v1160_v48, %v1152_v29 }
 0x3b6   : > { %v949_v50 = vpack.c.bf16 %v723_v49, %v723_v49 }
 0x3b8   : > { %744 = vst.msk [vmem:[%s1557_s20 + $0xc] sm:$0xf] %vm740_vm10, %v949_v50 }
 0x3b9   : > { %777 = vst.msk [vmem:[%s1557_s20 + $0xc] sm:$0xf] %vm773_vm11, %v768_v51 }
 0x3ba PF: > { %s954_s13 = sshll.u32 %s1297_s22, 8  ;;  %s1698_s30 = sld [smem:[#allocation14_spill]] }
 0x3bb   : > { %s797_s27 = sshll.u32 %s1557_s20, 4  ;;  %s1619_s26 = scalar_lea.sflag [#allocation6], %s229_s29  ;;  %s1615_s27 = int_to_ptr.vmem [resolvable:$true] %s797_s27 }
 0x3bc   : > { %s1189_s9 = scalar_lea.vmem %s1615_s27, 256  ;;  %s1319_s22 = smov [#allocation7]  }
 0x3bd   : > { %p1190_p9 = scmp.ne.s32.totalorder %s1615_s27, %s1189_s9  ;;  %s1193_s3 = sshll.u32 %s1319_s22, 4  ;;  %s1194_s3 = int_to_ptr.vmem [resolvable:$false] %s1193_s3 }
 0x3be   : > { %s1195_s28 = scalar_lea.vmem %s1194_s3, 512  ;;  %p1196_p13 = scmp.lt.s32.totalorder %s1615_s27, %s1194_s3 }
 0x3bf   : > { %p1191_p10 = pnand %p1190_p9, %p1429_p12  ;;  %p1197_p0 = scmp.lt.s32.totalorder %s1195_s28, %s1189_s9 }
 0x3c0   : > { %s1612_s8 = scalar_lea.hbm %s1698_s30, %s954_s13 }
 0x3c1   : > { %p1192_p11 = pneg %p1191_p10  ;;  %p1198_p3 = por %p1197_p0, %p1196_p13 }
 0x3c3   : > { %p1199_p1 = pnand %p1198_p3, %p1192_p11 }
 0x3c5   : > { %1202 = shalt.err (!%p1199_p1)
}
 0x3c6   : > { %s1203_s29 = scalar_lea.hbm %s1612_s8, 256  ;;  %s1207_s10 = scalar_lea.hbm %s1698_s30, 512 }
 0x3c7   : > { %p1204_p5 = scmp.ne.s32.totalorder %s1612_s8, %s1203_s29  ;;  %p1208_p6 = scmp.lt.s32.totalorder %s1612_s8, %s1698_s30 }
 0x3c8   : > { %p1209_p8 = scmp.lt.s32.totalorder %s1207_s10, %s1203_s29 }
 0x3c9   : > { %p1205_p4 = pnand %p1204_p5, %p1429_p12 }
 0x3ca   : > { %p1210_p9 = por %p1209_p8, %p1208_p6 }
 0x3cb   : > { %p1206_p7 = pneg %p1205_p4 }
 0x3cd   : > { %p1211_p10 = pnand %p1210_p9, %p1206_p7 }
 0x3cf   : > { %1214 = shalt.err (!%p1211_p10)
}
 0x3d0   : > { %s1320_s13 = smov 64   ;;  %s1321_s5 = smov 4  }
 0x3d1   : > { %1023 = dma.vmem_to_hbm [thread:$0]  (%p1429_p12), %s1615_s27, 256, %s1612_s8, %s1619_s26, %s1320_s13, %s1320_s13, %s1321_s5  }
 0x3d2 PF: > { %p1034_p11 = scmp.ge.s32.totalorder %s1309_s25, 2  ;;  %s815_s7 = sand.u32 1, %s1269_s15  }
 0x3d3   : > { %s816_s9 = scalar_lea.sflag [#allocation6], %s815_s7 }
 0x3d4   : > { %p1030_p13 = pnand %p1034_p11, %p1442_p2 }
 0x3d6   : > { %p1031_p0 = pneg %p1030_p13 }
 0x3d8   : > { %1264 = dma.done.wait (%p1031_p0), %s816_s9, 256  }
 0x3d9   : > { %1266 = vsyncadd (%p1031_p0), %s816_s9, 4294967040  ;;  %s21_s25 = sadd.s32 1, %s1309_s25   ;;  %s1699_s11 = sld [smem:[#allocation10_spill]] }
 0x3da   : > { %p18_p3 = scmp.ge.s32.totalorder %s21_s25, 6   ;;  %s1700_s20 = sld [smem:[#allocation13_spill]] }
 0x3db   : > { %s1701_s8 = sld [smem:[#allocation11_spill]]  ;;  %s1703_s15 = smov %s1273_s16 }
 0x3dc   : > { %s1702_s27 = sld [smem:[#allocation12_spill]]  ;;  %s1704_s16 = smov %s1277_s17 }
 0x3dd   : > { %s1705_s17 = smov %s1434_s12  ;;  %s1706_s18 = smov %s1285_s19 }
 0x3de   : > { %s1708_s21 = smov %s1301_s23  ;;  %s1709_s22 = smov %s1305_s24 }
 0x3df   : > { %s1707_s19 = smov %s1699_s11  ;;  %20 = sbr.rel (!%p18_p3) target bundleno = 11 (0xb), region = 101 }
 0x3e1   : > { %s1710_s23 = smov %s1701_s8 }
 0x3e2   : > { %s1711_s24 = smov %s1702_s27 }
 0x3e4   :  { %829 = vsyncpa [#allocation5], 1 }
 0x3e5   :  { %831 = vsyncpa [#allocation5 + $0x1], 1 }
 0x3e6   :  { %832 = vsyncpa [#allocation6], 1 }
 0x3e7   :  { %834 = vsyncpa [#allocation6 + $0x1], 1 }

</bundles_post_ra>
